<compile_context>
chip_gen: v7x
topology: tpu7x:2x2x1
jax: 0.10.0
libtpu: 0.0.40
codegen_flags: <defaults>
</compile_context>

<pallas_src>
import jax
import jax.numpy as jnp
from jax import lax
from jax.experimental import pallas as pl
from jax.experimental.pallas import tpu as pltpu

_EPS = 1e-5
_DEFAULT_BLOCK_BUDGET = 4 * 1024 * 1024     # bytes per x/out block (v7x-safe)
_BIG_VMEM_BLOCK_BUDGET = 6 * 1024 * 1024    # v5e/v6e (128 MiB physical VMEM)


def _round_down(v, m):
    return v // m * m


def _sublane_multiple(dtype):
    # Packed-sublane tile height: 8 for 4-byte, 16 for 2-byte, 32 for 1-byte.
    return max(8, 32 // jnp.dtype(dtype).itemsize)


def _block_budget_bytes():
    # Generation-aware block budget: bigger blocks where VMEM allows it.
    try:
        info = pltpu.get_tpu_info()
        vmem = getattr(info, "vmem_capacity_bytes", None)
        if vmem is not None and vmem >= 96 * 1024 * 1024:
            return _BIG_VMEM_BLOCK_BUDGET
    except Exception:
        pass
    return _DEFAULT_BLOCK_BUDGET


def _pick_tiles(rows, lanes, itemsize, sub):
    budget = _block_budget_bytes()
    # Lane tile: full spatial extent when it fits (a full-dim block is always
    # legal), else a 128-multiple cap that still leaves room for >= sub rows.
    lane_cap = max(128, _round_down(budget // (sub * itemsize), 128))
    thw = lanes if lanes <= lane_cap else lane_cap
    # Row tile: fill the byte budget; full extent (always legal) when R fits.
    max_rows = max(sub, _round_down(budget // (thw * itemsize), sub))
    tr = rows if rows <= max_rows else max_rows
    return tr, thw


def _make_kernel(compute_dtype):
    def _kernel(x_ref, scale_ref, shift_ref, o_ref):
        # x block: (tr, thw); scale/shift blocks: (tr, 1), already folded.
        x = x_ref[...].astype(compute_dtype)
        o_ref[...] = (x * scale_ref[...] + shift_ref[...]).astype(o_ref.dtype)
    return _kernel


def frozen_batch_norm_2d(x, weight, bias, running_mean, running_var):
    """x: (N, C, H, W); params: (C,). Frozen-BN affine: x*scale + shift."""
    N, C, H, W = x.shape
    HW = H * W
    R = N * C
    itemsize = jnp.dtype(x.dtype).itemsize

    # bf16 stays bf16 in-kernel (native VPU on v6e/v7x; v5e upcasts internally);
    # everything else computes in f32.
    compute_dtype = jnp.bfloat16 if x.dtype == jnp.bfloat16 else jnp.float32

    # Fold the 4 buffers into per-channel scale / shift once (tiny (C,) math).
    w32 = weight.astype(jnp.float32)
    b32 = bias.astype(jnp.float32)
    rm32 = running_mean.astype(jnp.float32)
    rv32 = running_var.astype(jnp.float32)
    scale = w32 * lax.rsqrt(rv32 + _EPS)          # (C,)
    shift = b32 - rm32 * scale                    # (C,)

    # Row r = n*C + c  ->  scale[c], shift[c].
    scale_rows = jnp.tile(scale, (N,)).astype(compute_dtype).reshape(R, 1)
    shift_rows = jnp.tile(shift, (N,)).astype(compute_dtype).reshape(R, 1)

    # Lane-dense 2D view; NO padding / output slicing (edge blocks only get
    # masked stores, which is negligible vs. an extra HBM pass).
    x2 = x.reshape(R, HW)

    sub = _sublane_multiple(x.dtype)
    tr, thw = _pick_tiles(R, HW, itemsize, sub)
    grid = (pl.cdiv(R, tr), pl.cdiv(HW, thw))     # spatial axis innermost

    param_spec = pl.BlockSpec((tr, 1), lambda i, j: (i, 0))

    out = pl.pallas_call(
        _make_kernel(compute_dtype),
        out_shape=jax.ShapeDtypeStruct((R, HW), x.dtype),
        grid_spec=pltpu.PrefetchScalarGridSpec(
            num_scalar_prefetch=0,
            grid=grid,
            in_specs=[
                pl.BlockSpec((tr, thw), lambda i, j: (i, j)),   # x tile
                param_spec,                                      # scale
                param_spec,                                      # shift
            ],
            out_specs=pl.BlockSpec((tr, thw), lambda i, j: (i, j)),
        ),
        compiler_params=pltpu.CompilerParams(
            # TODO(synk): on v7x switch the row axis to pltpu.CORE_PARALLEL if a
            # profile shows one TensorCore idle with plain "parallel".
            dimension_semantics=("parallel", "parallel"),
            # 2x(in)+2x(out) double-buffered blocks stay <= ~24 MiB; 32 MiB
            # leaves headroom on every generation (v7x TC has 64 MiB physical).
            vmem_limit_bytes=32 * 1024 * 1024,
        ),
    )(x2, scale_rows, shift_rows)

    return out.reshape(N, C, H, W)


if __name__ == "__main__":
    key = jax.random.PRNGKey(0)
    kx, kw, kb, km, kv = jax.random.split(key, 5)

    N, C, H, W = 2, 4, 16, 16
    x = jax.random.normal(kx, (N, C, H, W), dtype=jnp.float32)

    # FrozenBatchNorm2d __init__ gives ones/zeros; perturb deterministically so
    # the test is non-trivial but still "frozen".
    weight = jnp.ones((C,), jnp.float32) + 0.1 * jax.random.normal(kw, (C,), jnp.float32)
    bias = jnp.zeros((C,), jnp.float32) + 0.1 * jax.random.normal(kb, (C,), jnp.float32)
    running_mean = jnp.zeros((C,), jnp.float32) + 0.1 * jax.random.normal(km, (C,), jnp.float32)
    running_var = jnp.ones((C,), jnp.float32) + 0.1 * jnp.abs(
        jax.random.normal(kv, (C,), jnp.float32))

    y = frozen_batch_norm_2d(x, weight, bias, running_mean, running_var)
    y = jax.block_until_ready(y)

    # Pure-JAX reference mirroring the PyTorch forward exactly.
    eps = 1e-5
    w4 = weight.reshape(1, C, 1, 1)
    b4 = bias.reshape(1, C, 1, 1)
    rv4 = running_var.reshape(1, C, 1, 1)
    rm4 = running_mean.reshape(1, C, 1, 1)
    scale_ref = w4 * lax.rsqrt(rv4 + eps)
    bias_ref = b4 - rm4 * scale_ref
    y_ref = x * scale_ref + bias_ref

    assert y.shape == (N, C, H, W)
    assert jnp.allclose(y, y_ref, atol=1e-5, rtol=1e-5), "mismatch vs reference"

    print("KERNEL_OK")
</pallas_src>

<mosaic_0001>
module attributes {stable_mosaic.version = 11 : i64} {
  func.func @_kernel(%arg0: i32, %arg1: i32, %arg2: memref<8x256xf32, #tpu.memory_space<vmem>>, %arg3: memref<8x1xf32, #tpu.memory_space<vmem>>, %arg4: memref<8x1xf32, #tpu.memory_space<vmem>>, %arg5: memref<8x256xf32, #tpu.memory_space<vmem>>) attributes {dimension_semantics = [#tpu.dimension_semantics<parallel>, #tpu.dimension_semantics<parallel>], iteration_bounds = array<i64: 1, 1>, scalar_prefetch = 0 : i64, scratch_operands = 0 : i64, tpu.core_type = #tpu.core_type<tc>, window_params = [{transform_indices = @transform_0, window_bounds = array<i64: 8, 256>}, {transform_indices = @transform_1, window_bounds = array<i64: 8, 1>}, {transform_indices = @transform_2, window_bounds = array<i64: 8, 1>}, {transform_indices = @transform_3, window_bounds = array<i64: 8, 256>}]} {
    %c0 = arith.constant 0 : index
    %c0_0 = arith.constant 0 : index
    %0 = vector.load %arg2[%c0, %c0_0] : memref<8x256xf32, #tpu.memory_space<vmem>>, vector<8x256xf32>
    %c0_1 = arith.constant 0 : index
    %c0_2 = arith.constant 0 : index
    %1 = vector.load %arg3[%c0_1, %c0_2] : memref<8x1xf32, #tpu.memory_space<vmem>>, vector<8x1xf32>
    %2 = vector.broadcast %1 : vector<8x1xf32> to vector<8x256xf32>
    %3 = arith.mulf %0, %2 : vector<8x256xf32>
    %c0_3 = arith.constant 0 : index
    %c0_4 = arith.constant 0 : index
    %4 = vector.load %arg4[%c0_3, %c0_4] : memref<8x1xf32, #tpu.memory_space<vmem>>, vector<8x1xf32>
    %5 = vector.broadcast %4 : vector<8x1xf32> to vector<8x256xf32>
    %6 = arith.addf %3, %5 : vector<8x256xf32>
    %c0_5 = arith.constant 0 : index
    %c0_6 = arith.constant 0 : index
    %7 = vector.load %arg5[%c0_5, %c0_6] : memref<8x256xf32, #tpu.memory_space<vmem>>, vector<8x256xf32>
    tpu.vector_store %arg5[%c0_5, %c0_6], %6 {strides = array<i32>} : memref<8x256xf32, #tpu.memory_space<vmem>>, vector<8x256xf32>,
    return
  }
  func.func @transform_0(%arg0: i32, %arg1: i32) -> (i32, i32) {
    %c0_i32 = arith.constant 0 : i32
    return %arg0, %arg1 : i32, i32
  }
  func.func @transform_1(%arg0: i32, %arg1: i32) -> (i32, i32) {
    %c0_i32 = arith.constant 0 : i32
    %c0_i32_0 = arith.constant 0 : i32
    return %arg0, %c0_i32 : i32, i32
  }
  func.func @transform_2(%arg0: i32, %arg1: i32) -> (i32, i32) {
    %c0_i32 = arith.constant 0 : i32
    %c0_i32_0 = arith.constant 0 : i32
    return %arg0, %c0_i32 : i32, i32
  }
  func.func @transform_3(%arg0: i32, %arg1: i32) -> (i32, i32) {
    %c0_i32 = arith.constant 0 : i32
    return %arg0, %arg1 : i32, i32
  }
}

</mosaic_0001>

<bundles_post_ra>
// kernel: tpu_custom_call.1
= control target key start
LH: loop header
LB: loop body
LE: loop exit
PB: predicated region body
PF: predicated region fallthrough
CT: control target
= control target key end

     0   :  { %s122_s0 = inlined_call_operand.vmem [shape: f32[8,256], index: 0, kind: input, shape index: {}]   ;;  %s123_s1 = inlined_call_operand.vmem [shape: f32[8,1], index: 1, kind: input, shape index: {}]   ;;  %s124_s2 = inlined_call_operand.vmem [shape: f32[8,1], index: 2, kind: input, shape index: {}]   ;;  %s125_s3 = inlined_call_operand.hbm [shape: f32[8,256], index: 3, kind: output, shape index: {}]  }
   0x1   :  { %v17_v0 = vld [vmem:[%s123_s1] sm:$0xff] }
   0x2   :  { %8 = vsyncpa [#allocation3], 0  ;;  %v76_v1 = vmov 0   ;;  %v25_v2 = vld [vmem:[%s124_s2] sm:$0xff]  ;;  %v16_v5 = vld [vmem:[%s122_s0 + $0x8] sm:$0xff]  ;;  %s77_s20 = smov [#allocation2]  }
   0x3   :  { %51 = vset.pattern.permute.xlu0 %v76_v1  ;;  %v15_v4 = vld [vmem:[%s122_s0] sm:$0xff]  ;;  %s41_s1 = sshll.u32 %s77_s20, 4  ;;  %s42_s1 = int_to_ptr.vmem [resolvable:$true] %s41_s1 }
   0x4   :  { %20 = vperm.xlu0 %51, %v17_v0   ;;  %s52_s2 = scalar_lea.vmem %s42_s1, 256  ;;  %p57_p1 = scmp.lt.s32.totalorder %s42_s1, %s42_s1 }
   0x5   :  { %p53_p0 = scmp.ne.s32.totalorder %s42_s1, %s52_s2  ;;  %p58_p2 = scmp.lt.s32.totalorder %s52_s2, %s52_s2 }
   0x7   :  { %p59_p3 = por %p58_p2, %p57_p1 }
   0x8   :  { %28 = vperm.xlu0 %51, %v25_v2  }
   0x9   :  { %p60_p4 = pnand %p59_p3, %p53_p0 }
  0x83   :  { %v21_v3 = vpop.permute.xlu0 %20 }
  0x84   :  { %v23_v6 = vmul.f32 %v21_v3, %v15_v4  ;;  %v24_v7 = vmul.f32 %v21_v3, %v16_v5 }
  0x87   :  { %v29_v8 = vpop.permute.xlu0 %28 }
  0x88   :  { %v31_v9 = vadd.f32 %v29_v8, %v23_v6  ;;  %v32_v10 = vadd.f32 %v29_v8, %v24_v7 }
  0x8a   :  { %33 = vst [vmem:[#allocation2] sm:$0xff] %v31_v9  ;;  %34 = vst [vmem:[#allocation2 + $0x8] sm:$0xff] %v32_v10 }
  0x8b   :  { %63 = shalt.err (!%p60_p4)
}
  0x8c   :  { %s64_s0 = scalar_lea.hbm %s125_s3, 256 }
  0x8d   :  { %p65_p5 = scmp.ne.s32.totalorder %s125_s3, %s64_s0  ;;  %p68_p6 = scmp.lt.u32.totalorder %s64_s0, %s125_s3 }
  0x8f   :  { %p70_p7 = pnand %p68_p6, %p65_p5 }
  0x91   :  { %73 = shalt.err (!%p70_p7)
}
  0x92   :  { %44 = dma.vmem_to_hbm [thread:$0]  %s42_s1, 256, %s125_s3, [#allocation3]  }
  0x93   :  { %74 = dma.done.wait [#allocation3], 256  }
  0x94   :  { %75 = vsyncadd [#allocation3], 4294967040 }
  0x95   :  { %48 = vsyncpa [#allocation3], 1 }

</bundles_post_ra>
